<compile_context>
chip_gen: v6e
topology: v6e:2x2x1
jax: 0.10.0
libtpu: 0.0.40
codegen_flags: <defaults>
</compile_context>

<pallas_src>
import functools

import jax
import jax.numpy as jnp
from jax.experimental import pallas as pl
from jax.experimental.pallas import tpu as pltpu


def _round_up(x, m):
    return (x + m - 1) // m * m


def value_head_kernel(scalars_ref, x_ref, wrep_ref, wpack_ref, out_ref, *, c, hw):
    # scalars (SMEM): [0] = folded conv+BN bias, [1] = fc2 bias.
    b_fold = scalars_ref[0]
    b2 = scalars_ref[1]

    chw = c * hw
    lane = 128

    # ---- 1x1 conv + folded BN: exact f32 channel reduce on the VPU --------
    # x_ref block is (tile_b, C*HW) with x[b, c*HW + s]; wrep[0, c*HW+s] = w_f[c].
    if chw % lane == 0 and lane % hw == 0:
        # 1) accumulate aligned 128-lane blocks (keeps the live temp at
        #    (tile_b, 128) instead of a full (tile_b, CHW) product)
        nblk = chw // lane
        p = x_ref[:, 0:lane] * wrep_ref[:, 0:lane]
        for k in range(1, nblk):
            p = p + x_ref[:, k * lane:(k + 1) * lane] * wrep_ref[:, k * lane:(k + 1) * lane]
        # 2) fold the 128-lane partial down to HW lanes:
        #    y[b, s] = sum_t p[b, t*HW + s]
        r = lane // hw
        y = p[:, 0:hw]
        for t in range(1, r):
            y = y + p[:, t * hw:(t + 1) * hw]
    else:
        # generic fallback: per-channel slices (not hit for this module).
        y = x_ref[:, 0:hw] * wrep_ref[:, 0:hw]
        for cc in range(1, c):
            y = y + x_ref[:, cc * hw:(cc + 1) * hw] * wrep_ref[:, cc * hw:(cc + 1) * hw]

    y = jnp.maximum(y + b_fold, 0.0)                 # (tile_b, HW)

    # ---- FC head ----------------------------------------------------------
    w1 = wpack_ref[0:hw, :]                          # (HW, 32)  fc1 weight^T
    b1 = wpack_ref[hw:hw + 1, :]                     # (1, 32)   fc1 bias
    w2r = wpack_ref[hw + 1:hw + 2, :]                # (1, 32)   fc2 weight

    h = jnp.dot(y, w1, preferred_element_type=jnp.float32) + b1
    h = jnp.maximum(h, 0.0)                          # (tile_b, 32)

    # fc2 computed transposed -> (1, tile_b): lane-dense output stores.
    o = jax.lax.dot_general(w2r, h, (((1,), (1,)), ((), ())),
                            preferred_element_type=jnp.float32)
    out_ref[...] = jnp.tanh(o + b2)                  # (1, tile_b)


def prepare_params(params):
    """One-time folding/packing of module parameters (hoisted out of forward)."""
    f32 = jnp.float32
    C = params["conv_w"].shape[1]
    HW = params["fc1_w"].shape[1]

    # Fold eval-mode BN + conv bias into the conv weight/bias.
    scale = (params["bn_gamma"] /
             jnp.sqrt(params["bn_var"] + params["bn_eps"]))[0]
    w_f = (params["conv_w"].reshape(C) * scale).astype(f32)             # (C,)
    b_fold = (scale * (params["conv_b"][0] - params["bn_mean"][0])
              + params["bn_beta"][0]).astype(f32)

    # Per-flat-position conv scale: wrep[c*HW + s] = w_f[c]  (8 KiB).
    wrep = jnp.repeat(w_f, HW).reshape(1, C * HW).astype(f32)           # (1, CHW)

    # Pack the fc parameters into a single small VMEM operand.
    wpack = jnp.concatenate([
        params["fc1_w"].T.astype(f32),                                  # (HW, 32)
        params["fc1_b"].reshape(1, -1).astype(f32),                     # (1, 32)
        params["fc2_w"].reshape(1, -1).astype(f32),                     # (1, 32)
    ], axis=0)                                                          # (HW+2, 32)

    scalars = jnp.stack([b_fold, params["fc2_b"][0].astype(f32)])       # (2,)
    return {"wrep": wrep, "wpack": wpack, "scalars": scalars}


def value_head_forward(x_nchw, prep, tile_b_max=1024):
    """x_nchw: (B, C, H, W) float32 (NCHW, as in PyTorch). Returns (B, 1)."""
    f32 = jnp.float32
    B, C, H, W = x_nchw.shape
    HW = H * W
    CHW = C * HW
    hidden = prep["wpack"].shape[1]
    assert prep["wpack"].shape[0] == HW + 2
    assert prep["wrep"].shape[1] == CHW

    # NCHW -> (B, C*H*W) is a free reshape (no transpose / extra HBM pass).
    x2 = x_nchw.reshape(B, CHW).astype(f32)

    # Batch tiling (no jnp.pad: non-divisible batches use masked edge blocks).
    #  * B <= 128: one full-array tile (no alignment constraints).
    #  * B  > 128: >= 2 tiles (both v7x TensorCores), 128-multiple tile_b so
    #    the (1, tile_b) output blocks stay lane-aligned; capped at 1024 so
    #    double-buffered x (2 x 8 MiB) fits v7x's 64 MiB VMEM with headroom.
    if B <= 128:
        tile_b = B
    else:
        tile_b = min(_round_up(pl.cdiv(B, 2), 128), tile_b_max)
    n_tiles = pl.cdiv(B, tile_b)

    cost = pl.CostEstimate(
        flops=2 * B * CHW + 2 * B * HW * hidden + 2 * B * hidden,
        transcendentals=B,
        bytes_accessed=(B * CHW + CHW + (HW + 2) * hidden + 2 + B) * 4,
    )

    kernel = functools.partial(value_head_kernel, c=C, hw=HW)

    out = pl.pallas_call(
        kernel,
        out_shape=jax.ShapeDtypeStruct((1, B), f32),
        grid=(n_tiles,),
        in_specs=[
            pl.BlockSpec(memory_space=pltpu.MemorySpace.SMEM),          # scalars
            pl.BlockSpec((tile_b, CHW), lambda i: (i, 0)),              # x
            pl.BlockSpec((1, CHW), lambda i: (0, 0)),                   # conv scales
            pl.BlockSpec((HW + 2, hidden), lambda i: (0, 0)),           # fc pack
        ],
        out_specs=pl.BlockSpec((1, tile_b), lambda i: (0, i)),
        compiler_params=pltpu.CompilerParams(
            dimension_semantics=("parallel",),
            vmem_limit_bytes=32 * 1024 * 1024,
        ),
        cost_estimate=cost,
    )(prep["scalars"], x2, prep["wrep"], prep["wpack"])

    return out[0].reshape(B, 1)


def make_params(in_channels=32, spatial=8, hidden=32, seed=0):
    """Deterministic synthetic params matching ValueHead.__init__ shapes."""
    f32 = jnp.float32
    ks = jax.random.split(jax.random.PRNGKey(seed), 10)
    hw = spatial * spatial
    return {
        # nn.Conv2d(in_channels, 1, kernel_size=1)
        "conv_w": jax.random.normal(ks[0], (1, in_channels, 1, 1), f32) * 0.1,
        "conv_b": jax.random.normal(ks[1], (1,), f32) * 0.1,
        # nn.BatchNorm2d(1) (eval-mode running stats)
        "bn_gamma": 1.0 + jax.random.normal(ks[2], (1,), f32) * 0.1,
        "bn_beta": jax.random.normal(ks[3], (1,), f32) * 0.1,
        "bn_mean": jax.random.normal(ks[4], (1,), f32) * 0.1,
        "bn_var": 1.0 + jax.random.uniform(ks[5], (1,), f32) * 0.1,
        "bn_eps": 1e-5,
        # nn.Linear(8*8, 32)
        "fc1_w": jax.random.normal(ks[6], (hidden, hw), f32) * 0.1,
        "fc1_b": jax.random.normal(ks[7], (hidden,), f32) * 0.1,
        # nn.Linear(32, 1)
        "fc2_w": jax.random.normal(ks[8], (1, hidden), f32) * 0.1,
        "fc2_b": jax.random.normal(ks[9], (1,), f32) * 0.1,
    }


def reference_forward(x_nchw, params):
    """Plain-JAX reference mirroring the PyTorch forward (eval-mode BN)."""
    hp = jax.lax.Precision.HIGHEST
    B, C, H, W = x_nchw.shape
    scale = (params["bn_gamma"] /
             jnp.sqrt(params["bn_var"] + params["bn_eps"]))[0]
    z = jnp.einsum("bchw,c->bhw", x_nchw, params["conv_w"].reshape(C),
                   precision=hp) + params["conv_b"][0]
    z = scale * (z - params["bn_mean"][0]) + params["bn_beta"][0]
    y = jnp.maximum(z, 0.0).reshape(B, H * W)
    h = jnp.maximum(jnp.dot(y, params["fc1_w"].T, precision=hp)
                    + params["fc1_b"], 0.0)
    return jnp.tanh(jnp.dot(h, params["fc2_w"].T, precision=hp)
                    + params["fc2_b"])


if __name__ == "__main__":
    # fc1 = Linear(8*8, 32) forces 8x8 spatial; default in_channels = 32.
    B, C, H, W = 2, 32, 8, 8
    x = jax.random.normal(jax.random.PRNGKey(0), (B, C, H, W), dtype=jnp.float32)
    params = make_params(in_channels=C, spatial=H, hidden=32, seed=0)

    prep = prepare_params(params)                 # one-time param folding
    fwd = jax.jit(value_head_forward)
    out = jax.block_until_ready(fwd(x, prep))
    ref = reference_forward(x, params)

    assert out.shape == (B, 1), out.shape
    # Conv/BN path is exact f32 (VPU accumulate); fc matmuls run on the MXU,
    # so allow ~1e-3 slack for the MXU's f32 pass strategy.
    assert jnp.allclose(out, ref, atol=1e-3, rtol=1e-3), (out, ref)
    print("KERNEL_OK")
</pallas_src>

<mosaic_0001>
module attributes {stable_mosaic.version = 11 : i64} {
  func.func @value_head_kernel(%arg0: i32, %arg1: memref<2xf32, #tpu.memory_space<smem>>, %arg2: memref<2x2048xf32, #tpu.memory_space<vmem>>, %arg3: memref<1x2048xf32, #tpu.memory_space<vmem>>, %arg4: memref<66x32xf32, #tpu.memory_space<vmem>>, %arg5: memref<1x2xf32, #tpu.memory_space<vmem>>) attributes {dimension_semantics = [#tpu.dimension_semantics<parallel>], iteration_bounds = array<i64: 1>, scalar_prefetch = 0 : i64, scratch_operands = 0 : i64, tpu.core_type = #tpu.core_type<tc>, window_params = [{transform_indices = @transform_0, window_bounds = array<i64: 2>}, {transform_indices = @transform_1, window_bounds = array<i64: 2, 2048>}, {pipeline_mode = #tpu.pipeline_mode<synchronous>, transform_indices = @transform_2, window_bounds = array<i64: 1, 2048>}, {pipeline_mode = #tpu.pipeline_mode<synchronous>, transform_indices = @transform_3, window_bounds = array<i64: 66, 32>}, {transform_indices = @transform_4, window_bounds = array<i64: 1, 2>}]} {
    %c0 = arith.constant 0 : index
    %0 = memref.load %arg1[%c0] : memref<2xf32, #tpu.memory_space<smem>>
    %c1 = arith.constant 1 : index
    %1 = memref.load %arg1[%c1] : memref<2xf32, #tpu.memory_space<smem>>
    %c0_0 = arith.constant 0 : index
    %c0_1 = arith.constant 0 : index
    %2 = vector.load %arg2[%c0_0, %c0_1] : memref<2x2048xf32, #tpu.memory_space<vmem>>, vector<2x128xf32>
    %c0_2 = arith.constant 0 : index
    %c0_3 = arith.constant 0 : index
    %3 = vector.load %arg3[%c0_2, %c0_3] : memref<1x2048xf32, #tpu.memory_space<vmem>>, vector<1x128xf32>
    %4 = vector.broadcast %3 : vector<1x128xf32> to vector<2x128xf32>
    %5 = arith.mulf %2, %4 : vector<2x128xf32>
    %c0_4 = arith.constant 0 : index
    %c128 = arith.constant 128 : index
    %6 = vector.load %arg2[%c0_4, %c128] : memref<2x2048xf32, #tpu.memory_space<vmem>>, vector<2x128xf32>
    %c0_5 = arith.constant 0 : index
    %c128_6 = arith.constant 128 : index
    %7 = vector.load %arg3[%c0_5, %c128_6] : memref<1x2048xf32, #tpu.memory_space<vmem>>, vector<1x128xf32>
    %8 = vector.broadcast %7 : vector<1x128xf32> to vector<2x128xf32>
    %9 = arith.mulf %6, %8 : vector<2x128xf32>
    %10 = arith.addf %5, %9 : vector<2x128xf32>
    %c0_7 = arith.constant 0 : index
    %c256 = arith.constant 256 : index
    %11 = vector.load %arg2[%c0_7, %c256] : memref<2x2048xf32, #tpu.memory_space<vmem>>, vector<2x128xf32>
    %c0_8 = arith.constant 0 : index
    %c256_9 = arith.constant 256 : index
    %12 = vector.load %arg3[%c0_8, %c256_9] : memref<1x2048xf32, #tpu.memory_space<vmem>>, vector<1x128xf32>
    %13 = vector.broadcast %12 : vector<1x128xf32> to vector<2x128xf32>
    %14 = arith.mulf %11, %13 : vector<2x128xf32>
    %15 = arith.addf %10, %14 : vector<2x128xf32>
    %c0_10 = arith.constant 0 : index
    %c384 = arith.constant 384 : index
    %16 = vector.load %arg2[%c0_10, %c384] : memref<2x2048xf32, #tpu.memory_space<vmem>>, vector<2x128xf32>
    %c0_11 = arith.constant 0 : index
    %c384_12 = arith.constant 384 : index
    %17 = vector.load %arg3[%c0_11, %c384_12] : memref<1x2048xf32, #tpu.memory_space<vmem>>, vector<1x128xf32>
    %18 = vector.broadcast %17 : vector<1x128xf32> to vector<2x128xf32>
    %19 = arith.mulf %16, %18 : vector<2x128xf32>
    %20 = arith.addf %15, %19 : vector<2x128xf32>
    %c0_13 = arith.constant 0 : index
    %c512 = arith.constant 512 : index
    %21 = vector.load %arg2[%c0_13, %c512] : memref<2x2048xf32, #tpu.memory_space<vmem>>, vector<2x128xf32>
    %c0_14 = arith.constant 0 : index
    %c512_15 = arith.constant 512 : index
    %22 = vector.load %arg3[%c0_14, %c512_15] : memref<1x2048xf32, #tpu.memory_space<vmem>>, vector<1x128xf32>
    %23 = vector.broadcast %22 : vector<1x128xf32> to vector<2x128xf32>
    %24 = arith.mulf %21, %23 : vector<2x128xf32>
    %25 = arith.addf %20, %24 : vector<2x128xf32>
    %c0_16 = arith.constant 0 : index
    %c640 = arith.constant 640 : index
    %26 = vector.load %arg2[%c0_16, %c640] : memref<2x2048xf32, #tpu.memory_space<vmem>>, vector<2x128xf32>
    %c0_17 = arith.constant 0 : index
    %c640_18 = arith.constant 640 : index
    %27 = vector.load %arg3[%c0_17, %c640_18] : memref<1x2048xf32, #tpu.memory_space<vmem>>, vector<1x128xf32>
    %28 = vector.broadcast %27 : vector<1x128xf32> to vector<2x128xf32>
    %29 = arith.mulf %26, %28 : vector<2x128xf32>
    %30 = arith.addf %25, %29 : vector<2x128xf32>
    %c0_19 = arith.constant 0 : index
    %c768 = arith.constant 768 : index
    %31 = vector.load %arg2[%c0_19, %c768] : memref<2x2048xf32, #tpu.memory_space<vmem>>, vector<2x128xf32>
    %c0_20 = arith.constant 0 : index
    %c768_21 = arith.constant 768 : index
    %32 = vector.load %arg3[%c0_20, %c768_21] : memref<1x2048xf32, #tpu.memory_space<vmem>>, vector<1x128xf32>
    %33 = vector.broadcast %32 : vector<1x128xf32> to vector<2x128xf32>
    %34 = arith.mulf %31, %33 : vector<2x128xf32>
    %35 = arith.addf %30, %34 : vector<2x128xf32>
    %c0_22 = arith.constant 0 : index
    %c896 = arith.constant 896 : index
    %36 = vector.load %arg2[%c0_22, %c896] : memref<2x2048xf32, #tpu.memory_space<vmem>>, vector<2x128xf32>
    %c0_23 = arith.constant 0 : index
    %c896_24 = arith.constant 896 : index
    %37 = vector.load %arg3[%c0_23, %c896_24] : memref<1x2048xf32, #tpu.memory_space<vmem>>, vector<1x128xf32>
    %38 = vector.broadcast %37 : vector<1x128xf32> to vector<2x128xf32>
    %39 = arith.mulf %36, %38 : vector<2x128xf32>
    %40 = arith.addf %35, %39 : vector<2x128xf32>
    %c0_25 = arith.constant 0 : index
    %c1024 = arith.constant 1024 : index
    %41 = vector.load %arg2[%c0_25, %c1024] : memref<2x2048xf32, #tpu.memory_space<vmem>>, vector<2x128xf32>
    %c0_26 = arith.constant 0 : index
    %c1024_27 = arith.constant 1024 : index
    %42 = vector.load %arg3[%c0_26, %c1024_27] : memref<1x2048xf32, #tpu.memory_space<vmem>>, vector<1x128xf32>
    %43 = vector.broadcast %42 : vector<1x128xf32> to vector<2x128xf32>
    %44 = arith.mulf %41, %43 : vector<2x128xf32>
    %45 = arith.addf %40, %44 : vector<2x128xf32>
    %c0_28 = arith.constant 0 : index
    %c1152 = arith.constant 1152 : index
    %46 = vector.load %arg2[%c0_28, %c1152] : memref<2x2048xf32, #tpu.memory_space<vmem>>, vector<2x128xf32>
    %c0_29 = arith.constant 0 : index
    %c1152_30 = arith.constant 1152 : index
    %47 = vector.load %arg3[%c0_29, %c1152_30] : memref<1x2048xf32, #tpu.memory_space<vmem>>, vector<1x128xf32>
    %48 = vector.broadcast %47 : vector<1x128xf32> to vector<2x128xf32>
    %49 = arith.mulf %46, %48 : vector<2x128xf32>
    %50 = arith.addf %45, %49 : vector<2x128xf32>
    %c0_31 = arith.constant 0 : index
    %c1280 = arith.constant 1280 : index
    %51 = vector.load %arg2[%c0_31, %c1280] : memref<2x2048xf32, #tpu.memory_space<vmem>>, vector<2x128xf32>
    %c0_32 = arith.constant 0 : index
    %c1280_33 = arith.constant 1280 : index
    %52 = vector.load %arg3[%c0_32, %c1280_33] : memref<1x2048xf32, #tpu.memory_space<vmem>>, vector<1x128xf32>
    %53 = vector.broadcast %52 : vector<1x128xf32> to vector<2x128xf32>
    %54 = arith.mulf %51, %53 : vector<2x128xf32>
    %55 = arith.addf %50, %54 : vector<2x128xf32>
    %c0_34 = arith.constant 0 : index
    %c1408 = arith.constant 1408 : index
    %56 = vector.load %arg2[%c0_34, %c1408] : memref<2x2048xf32, #tpu.memory_space<vmem>>, vector<2x128xf32>
    %c0_35 = arith.constant 0 : index
    %c1408_36 = arith.constant 1408 : index
    %57 = vector.load %arg3[%c0_35, %c1408_36] : memref<1x2048xf32, #tpu.memory_space<vmem>>, vector<1x128xf32>
    %58 = vector.broadcast %57 : vector<1x128xf32> to vector<2x128xf32>
    %59 = arith.mulf %56, %58 : vector<2x128xf32>
    %60 = arith.addf %55, %59 : vector<2x128xf32>
    %c0_37 = arith.constant 0 : index
    %c1536 = arith.constant 1536 : index
    %61 = vector.load %arg2[%c0_37, %c1536] : memref<2x2048xf32, #tpu.memory_space<vmem>>, vector<2x128xf32>
    %c0_38 = arith.constant 0 : index
    %c1536_39 = arith.constant 1536 : index
    %62 = vector.load %arg3[%c0_38, %c1536_39] : memref<1x2048xf32, #tpu.memory_space<vmem>>, vector<1x128xf32>
    %63 = vector.broadcast %62 : vector<1x128xf32> to vector<2x128xf32>
    %64 = arith.mulf %61, %63 : vector<2x128xf32>
    %65 = arith.addf %60, %64 : vector<2x128xf32>
    %c0_40 = arith.constant 0 : index
    %c1664 = arith.constant 1664 : index
    %66 = vector.load %arg2[%c0_40, %c1664] : memref<2x2048xf32, #tpu.memory_space<vmem>>, vector<2x128xf32>
    %c0_41 = arith.constant 0 : index
    %c1664_42 = arith.constant 1664 : index
    %67 = vector.load %arg3[%c0_41, %c1664_42] : memref<1x2048xf32, #tpu.memory_space<vmem>>, vector<1x128xf32>
    %68 = vector.broadcast %67 : vector<1x128xf32> to vector<2x128xf32>
    %69 = arith.mulf %66, %68 : vector<2x128xf32>
    %70 = arith.addf %65, %69 : vector<2x128xf32>
    %c0_43 = arith.constant 0 : index
    %c1792 = arith.constant 1792 : index
    %71 = vector.load %arg2[%c0_43, %c1792] : memref<2x2048xf32, #tpu.memory_space<vmem>>, vector<2x128xf32>
    %c0_44 = arith.constant 0 : index
    %c1792_45 = arith.constant 1792 : index
    %72 = vector.load %arg3[%c0_44, %c1792_45] : memref<1x2048xf32, #tpu.memory_space<vmem>>, vector<1x128xf32>
    %73 = vector.broadcast %72 : vector<1x128xf32> to vector<2x128xf32>
    %74 = arith.mulf %71, %73 : vector<2x128xf32>
    %75 = arith.addf %70, %74 : vector<2x128xf32>
    %c0_46 = arith.constant 0 : index
    %c1920 = arith.constant 1920 : index
    %76 = vector.load %arg2[%c0_46, %c1920] : memref<2x2048xf32, #tpu.memory_space<vmem>>, vector<2x128xf32>
    %c0_47 = arith.constant 0 : index
    %c1920_48 = arith.constant 1920 : index
    %77 = vector.load %arg3[%c0_47, %c1920_48] : memref<1x2048xf32, #tpu.memory_space<vmem>>, vector<1x128xf32>
    %78 = vector.broadcast %77 : vector<1x128xf32> to vector<2x128xf32>
    %79 = arith.mulf %76, %78 : vector<2x128xf32>
    %80 = arith.addf %75, %79 : vector<2x128xf32>
    %81 = vector.extract_strided_slice %80 {offsets = [0, 0], sizes = [2, 64], strides = [1, 1]} : vector<2x128xf32> to vector<2x64xf32>
    %82 = vector.extract_strided_slice %80 {offsets = [0, 64], sizes = [2, 64], strides = [1, 1]} : vector<2x128xf32> to vector<2x64xf32>
    %83 = arith.addf %81, %82 : vector<2x64xf32>
    %84 = vector.broadcast %0 : f32 to vector<2x64xf32>
    %85 = arith.addf %83, %84 : vector<2x64xf32>
    %cst = arith.constant 0.000000e+00 : f32
    %86 = vector.broadcast %cst : f32 to vector<2x64xf32>
    %87 = arith.maximumf %85, %86 : vector<2x64xf32>
    %c0_49 = arith.constant 0 : index
    %c0_50 = arith.constant 0 : index
    %88 = vector.load %arg4[%c0_49, %c0_50] : memref<66x32xf32, #tpu.memory_space<vmem>>, vector<64x32xf32>
    %c64 = arith.constant 64 : index
    %c0_51 = arith.constant 0 : index
    %89 = vector.load %arg4[%c64, %c0_51] : memref<66x32xf32, #tpu.memory_space<vmem>>, vector<1x32xf32>
    %c65 = arith.constant 65 : index
    %c0_52 = arith.constant 0 : index
    %90 = vector.load %arg4[%c65, %c0_52] : memref<66x32xf32, #tpu.memory_space<vmem>>, vector<1x32xf32>
    %cst_53 = arith.constant dense<0.000000e+00> : vector<2x32xf32>
    %91 = tpu.matmul %87, %88, %cst_53 {dimension_numbers = #tpu.dot_dimension_numbers<[1], [0], [0], [1], [0, 0, 1, 1], [], []>} : vector<2x64xf32>, vector<64x32xf32>, vector<2x32xf32> -> vector<2x32xf32>
    %92 = vector.broadcast %89 : vector<1x32xf32> to vector<2x32xf32>
    %93 = arith.addf %91, %92 : vector<2x32xf32>
    %cst_54 = arith.constant 0.000000e+00 : f32
    %94 = vector.broadcast %cst_54 : f32 to vector<2x32xf32>
    %95 = arith.maximumf %93, %94 : vector<2x32xf32>
    %cst_55 = arith.constant dense<0.000000e+00> : vector<1x2xf32>
    %96 = tpu.matmul %90, %95, %cst_55 {dimension_numbers = #tpu.dot_dimension_numbers<[1], [1], [0], [0], [0, 0, 1, 0], [], []>} : vector<1x32xf32>, vector<2x32xf32>, vector<1x2xf32> -> vector<1x2xf32>
    %97 = vector.broadcast %1 : f32 to vector<1x2xf32>
    %98 = arith.addf %96, %97 : vector<1x2xf32>
    %99 = math.tanh %98 : vector<1x2xf32>
    %c0_56 = arith.constant 0 : index
    %c0_57 = arith.constant 0 : index
    %100 = vector.load %arg5[%c0_56, %c0_57] : memref<1x2xf32, #tpu.memory_space<vmem>>, vector<1x2xf32>
    tpu.vector_store %arg5[%c0_56, %c0_57], %99 {strides = array<i32>} : memref<1x2xf32, #tpu.memory_space<vmem>>, vector<1x2xf32>,
    return
  }
  func.func @transform_0(%arg0: i32) -> i32 {
    %c0_i32 = arith.constant 0 : i32
    %c0_i32_0 = arith.constant 0 : i32
    return %c0_i32 : i32
  }
  func.func @transform_1(%arg0: i32) -> (i32, i32) {
    %c0_i32 = arith.constant 0 : i32
    %c0_i32_0 = arith.constant 0 : i32
    return %arg0, %c0_i32 : i32, i32
  }
  func.func @transform_2(%arg0: i32) -> (i32, i32) {
    %c0_i32 = arith.constant 0 : i32
    %c0_i32_0 = arith.constant 0 : i32
    %c0_i32_1 = arith.constant 0 : i32
    return %c0_i32, %c0_i32_0 : i32, i32
  }
  func.func @transform_3(%arg0: i32) -> (i32, i32) {
    %c0_i32 = arith.constant 0 : i32
    %c0_i32_0 = arith.constant 0 : i32
    %c0_i32_1 = arith.constant 0 : i32
    return %c0_i32, %c0_i32_0 : i32, i32
  }
  func.func @transform_4(%arg0: i32) -> (i32, i32) {
    %c0_i32 = arith.constant 0 : i32
    %c0_i32_0 = arith.constant 0 : i32
    return %c0_i32, %arg0 : i32, i32
  }
}

</mosaic_0001>

<bundles_post_ra>
// kernel: value_head_forward.1
= control target key start
LH: loop header
LB: loop body
LE: loop exit
PB: predicated region body
PF: predicated region fallthrough
CT: control target
= control target key end

     0   :  { %9 = vsyncpa [#allocation4], 0  ;;  %s646_s0 = inlined_call_operand.vmem [shape: f32[2], index: 0, kind: input, shape index: {}]   ;;  %s647_s1 = inlined_call_operand.vmem [shape: f32[2,2048], index: 1, kind: input, shape index: {}]   ;;  %s648_s2 = inlined_call_operand.vmem [shape: f32[1,2048], index: 2, kind: input, shape index: {}]   ;;  %s649_s3 = inlined_call_operand.vmem [shape: f32[66,32], index: 3, kind: input, shape index: {}]   ;;  %s650_s4 = inlined_call_operand.hbm [shape: f32[1,2], index: 4, kind: output, shape index: {}]  }
   0x1   :  { %10 = vsyncpa [#allocation3], 0  ;;  %s17_s17 = sshll.u32 %s646_s0, 4  ;;  %s18_s17 = int_to_ptr.vmem [resolvable:$true] %s17_s17 }
   0x2   :  { %s448_s18 = scalar_lea.vmem %s18_s17, 16  ;;  %p453_p1 = scmp.lt.s32.totalorder %s18_s17, %s18_s17 }
   0x3   :  { %p449_p0 = scmp.ne.s32.totalorder %s18_s17, %s448_s18  ;;  %p454_p2 = scmp.lt.s32.totalorder %s448_s18, %s448_s18 }
   0x5   :  { %p455_p3 = por %p454_p2, %p453_p1 }
   0x7   :  { %p456_p4 = pnand %p455_p3, %p449_p0 }
   0x9   :  { %459 = shalt.err (!%p456_p4)
}
   0xa   :  { %s484_s19 = smov [#allocation2]  }
   0xb   :  { %20 = dma.vmem_to_smem %s18_s17, 16, %s484_s19, [#allocation4]  }
   0xc   :  { %480 = dma.done.wait [#allocation4], 16  }
   0xd   :  { %481 = vsyncadd [#allocation4], 4294967280 }
   0xe   :  { %30 = sfence }
   0xf   :  { %v33_v0 = vld [vmem:[%s647_s1] sm:$0x3]  ;;  %v42_v2 = vld [vmem:[%s647_s1 + $0x2] sm:$0x3]  ;;  %v52_v5 = vld [vmem:[%s647_s1 + $0x4] sm:$0x3] }
  0x10   :  { %v386_v1 = vld [vmem:[%s648_s2] ss:$0 sm:$0xff]  ;;  %v387_v4 = vld [vmem:[%s648_s2 + $0x1] ss:$0 sm:$0xff]  ;;  %v388_v6 = vld [vmem:[%s648_s2 + $0x2] ss:$0 sm:$0xff] }
  0x11   :  { %v41_v3 = vmul.f32 %v386_v1, %v33_v0  ;;  %v50_v7 = vmul.f32 %v387_v4, %v42_v2  ;;  %v60_v8 = vmul.f32 %v388_v6, %v52_v5  ;;  %v62_v9 = vld [vmem:[%s647_s1 + $0x6] sm:$0x3]  ;;  %v389_v10 = vld [vmem:[%s648_s2 + $0x3] ss:$0 sm:$0xff]  ;;  %v72_v11 = vld [vmem:[%s647_s1 + $0x8] sm:$0x3] }
  0x12   :  { %v390_v12 = vld [vmem:[%s648_s2 + $0x4] ss:$0 sm:$0xff]  ;;  %v70_v14 = vmul.f32 %v389_v10, %v62_v9  ;;  %v82_v15 = vld [vmem:[%s647_s1 + $0xa] sm:$0x3]  ;;  %v391_v16 = vld [vmem:[%s648_s2 + $0x5] ss:$0 sm:$0xff] }
  0x13   :  { %v51_v13 = vadd.f32 %v50_v7, %v41_v3  ;;  %v80_v18 = vmul.f32 %v390_v12, %v72_v11  ;;  %v92_v19 = vld [vmem:[%s647_s1 + $0xc] sm:$0x3]  ;;  %v392_v20 = vld [vmem:[%s648_s2 + $0x6] ss:$0 sm:$0xff]  ;;  %v90_v22 = vmul.f32 %v391_v16, %v82_v15  ;;  %v102_v23 = vld [vmem:[%s647_s1 + $0xe] sm:$0x3] }
  0x14   :  { %v393_v24 = vld [vmem:[%s648_s2 + $0x7] ss:$0 sm:$0xff]  ;;  %v100_v26 = vmul.f32 %v392_v20, %v92_v19  ;;  %v112_v27 = vld [vmem:[%s647_s1 + $0x10] sm:$0x3]  ;;  %v394_v28 = vld [vmem:[%s648_s2 + $0x8] ss:$0 sm:$0xff] }
  0x15   :  { %v61_v17 = vadd.f32 %v60_v8, %v51_v13  ;;  %v485_v29 = vmov 0.0   ;;  %v207_v30 = vld [vmem:[%s649_s3 + $0x38] sm:$0xff]  ;;  %v206_v31 = vld [vmem:[%s649_s3 + $0x30] sm:$0xff]  ;;  %v110_v33 = vmul.f32 %v393_v24, %v102_v23  ;;  %v395_v35 = vld [vmem:[%s648_s2 + $0x9] ss:$0 sm:$0xff]  ;;  %v120_v38 = vmul.f32 %v394_v28, %v112_v27  ;;  %s31_s19 = sld [smem:[#allocation2]] }
  0x16   :  { %417 = vmatprep.subr.mxu0 %v485_v29  ;;  %436 = vmatprep.subr.mxu1 %v485_v29  ;;  %v122_v34 = vld [vmem:[%s647_s1 + $0x12] sm:$0x3]  ;;  %v205_v36 = vld [vmem:[%s649_s3 + $0x28] sm:$0xff]  ;;  %v132_v39 = vld [vmem:[%s647_s1 + $0x14] sm:$0x3]  ;;  %vm486_vm0 = vmmov 0  }
  0x17   :  { %v71_v21 = vadd.f32 %v70_v14, %v61_v17  ;;  %418 = vmatpush3.msra.mxu0 %v207_v30  ;;  %v396_v40 = vld [vmem:[%s648_s2 + $0xa] ss:$0 sm:$0xff]  ;;  %v204_v41 = vld [vmem:[%s649_s3 + $0x20] sm:$0xff]  ;;  %v130_v43 = vmul.f32 %v395_v35, %v122_v34  ;;  %v142_v44 = vld [vmem:[%s647_s1 + $0x16] sm:$0x3]  ;;  %433 = vmatprep.mubr.msk.f32.mxu0 %vm486_vm0, %v485_v29  ;;  %vm214_vm1 = vcmask 523264  }
  0x18   :  { %419 = vmatprep.subr.mxu0 %v485_v29  ;;  %v397_v45 = vld [vmem:[%s648_s2 + $0xb] ss:$0 sm:$0xff]  ;;  %v140_v47 = vmul.f32 %v396_v40, %v132_v39  ;;  %v152_v48 = vld [vmem:[%s647_s1 + $0x18] sm:$0x3]  ;;  %v398_v49 = vld [vmem:[%s648_s2 + $0xc] ss:$0 sm:$0xff]  ;;  %438 = vmatprep.mubr.msk.f32.mxu1 %vm486_vm0, %v485_v29 }
  0x19   :  { %v81_v25 = vadd.f32 %v80_v18, %v71_v21  ;;  %420 = vmatpush3.msra.mxu0 %v206_v31  ;;  %v203_v50 = vld [vmem:[%s649_s3 + $0x18] sm:$0xff]  ;;  %v150_v52 = vmul.f32 %v397_v45, %v142_v44  ;;  %v399_v54 = vld [vmem:[%s648_s2 + $0xd] ss:$0 sm:$0xff]  ;;  %v202_v55 = vld [vmem:[%s649_s3 + $0x10] sm:$0xff]  ;;  %v160_v57 = vmul.f32 %v398_v49, %v152_v48  ;;  %vm290_vm2 = vcmask 261120   ;;  %s385_s23 = sld [smem:[#allocation2 + $0x1]] }
  0x1a   :  { %421 = vmatprep.subr.mxu0 %v485_v29  ;;  %v162_v53 = vld [vmem:[%s647_s1 + $0x1a] sm:$0x3]  ;;  %v172_v58 = vld [vmem:[%s647_s1 + $0x1c] sm:$0x3]  ;;  %v400_v59 = vld [vmem:[%s648_s2 + $0xe] ss:$0 sm:$0xff] }
  0x1b   :  { %v91_v32 = vadd.f32 %v90_v22, %v81_v25  ;;  %422 = vmatpush3.msra.mxu0 %v205_v36  ;;  %v201_v60 = vld [vmem:[%s649_s3 + $0x8] sm:$0xff]  ;;  %v170_v62 = vmul.f32 %v399_v54, %v162_v53  ;;  %v182_v63 = vld [vmem:[%s647_s1 + $0x1e] sm:$0x3]  ;;  %v200_v1 = vld [vmem:[%s649_s3] sm:$0xff]  ;;  %v180_v3 = vmul.f32 %v400_v59, %v172_v58  ;;  %s487_s1 = smov 64   ;;  %v197_v9 = vstv %s31_s19  ;;  %s488_s0 = smov [#allocation5]  }
  0x1c   :  { %423 = vmatprep.subr.mxu0 %v485_v29  ;;  %v401_v0 = vld [vmem:[%s648_s2 + $0xf] ss:$0 sm:$0xff]  ;;  %v402_v13 = vld [vmem:[%s649_s3 + $0x40] ss:$0 sm:$0xff]  ;;  %v209_v18 = vld [vmem:[%s649_s3 + $0x41] sm:$0x1] }
  0x1d   :  { %v101_v37 = vadd.f32 %v100_v26, %v91_v32  ;;  %424 = vmatpush3.msra.mxu0 %v204_v41  ;;  %v190_v5 = vmul.f32 %v401_v0, %v182_v63  ;;  %s376_s24 = sshll.u32 %s488_s0, 4  ;;  %vm368_vm3 = vcmask 8192   ;;  %s377_s24 = int_to_ptr.vmem [resolvable:$true] %s376_s24 }
  0x1e   :  { %425 = vmatprep.subr.mxu0 %v485_v29  ;;  %s460_s25 = scalar_lea.vmem %s377_s24, 16  ;;  %s464_s26 = scalar_lea.vmem %s377_s24, 32 }
  0x1f   :  { %v111_v42 = vadd.f32 %v110_v33, %v101_v37  ;;  %426 = vmatpush3.msra.mxu0 %v203_v50  ;;  %v289_v19 = vstv %s385_s23  ;;  %p461_p5 = scmp.ne.s32.totalorder %s377_s24, %s460_s25  ;;  %p465_p6 = scmp.lt.s32.totalorder %s377_s24, %s377_s24 }
  0x20   :  { %427 = vmatprep.subr.mxu0 %v485_v29  ;;  %p466_p7 = scmp.lt.s32.totalorder %s464_s26, %s460_s25 }
  0x21   :  { %v121_v46 = vadd.f32 %v120_v38, %v111_v42  ;;  %428 = vmatpush3.msra.mxu0 %v202_v55 }
  0x22   :  { %429 = vmatprep.subr.mxu0 %v485_v29  ;;  %p467_p8 = por %p466_p7, %p465_p6 }
  0x23   :  { %v131_v51 = vadd.f32 %v130_v43, %v121_v46  ;;  %430 = vmatpush3.msra.mxu0 %v201_v60 }
  0x24   :  { %431 = vmatprep.subr.mxu0 %v485_v29  ;;  %p468_p9 = pnand %p467_p8, %p461_p5 }
  0x25   :  { %v141_v56 = vadd.f32 %v140_v47, %v131_v51  ;;  %432 = vmatpush3.msra.mxu0 %v200_v1 }
  0x27   :  { %v151_v61 = vadd.f32 %v150_v52, %v141_v56 }
  0x29   :  { %v161_v2 = vadd.f32 %v160_v57, %v151_v61 }
  0x2b   :  { %v171_v4 = vadd.f32 %v170_v62, %v161_v2 }
  0x2d   :  { %v181_v6 = vadd.f32 %v180_v3, %v171_v4 }
  0x2f   :  { %v191_v7 = vadd.f32 %v190_v5, %v181_v6 }
  0x31   :  { %193 = vrot.lane.b32.xlu0 %v191_v7, %s487_s1 }
  0xa3   :  { %v194_v8 = vpop.permute.xlu0 %193 }
  0xa4   :  { %v196_v10 = vadd.f32 %v194_v8, %v191_v7 }
  0xa6   :  { %v198_v11 = vadd.f32 %v197_v9, %v196_v10 }
  0xa8   :  { %v199_v12 = vmax.f32 %v198_v11, 0.0 }
  0xaa   :  { %434 = vmatmul.mubr.msk.f32.vlgmr.msra.gmra.mxu0 %vm214_vm1, %v199_v12 }
 0x16a   :  { %v284_v14 = vpop.f32.mrf.mxu0 }
 0x16b   :  { %v285_v15 = vadd.f32 %v402_v13, %v284_v14 }
 0x16c   :  { %v435_v16 = vpop.f32.mrf.mxu0 }
 0x16d   :  { %v288_v17 = vmax.f32 %v285_v15, 0.0 }
 0x16f   :  { %437 = vmatpush3.xpose.msk.msra.mxu1 %vm290_vm2, %v288_v17 }
 0x172   :  { %439 = vmatmul.mubr.msk.f32.vlgmr.msra.gmra.mxu1 %vm290_vm2, %v209_v18 }
 0x232   :  { %v363_v20 = vpop.f32.mrf.mxu1 }
 0x233   :  { %v364_v21 = vadd.f32 %v363_v20, %v289_v19 }
 0x234   :  { %v440_v22 = vpop.f32.mrf.mxu1 }
 0x235   :  { %446 = vtanh.f32 %v364_v21 }
 0x242   :  { %v447_v23 = vpop.eup %446 }
 0x243   :  { %369 = vst.msk [vmem:[#allocation5] sm:$0x1] %vm368_vm3, %v447_v23 }
 0x244   :  { %471 = shalt.err (!%p468_p9)
}
 0x245   :  { %379 = dma.vmem_to_hbm [thread:$0]  %s377_s24, 16, %s650_s4, [#allocation3]  }
 0x246   :  { %482 = dma.done.wait [#allocation3], 16  }
 0x247   :  { %483 = vsyncadd [#allocation3], 4294967280 }
 0x248   :  { %383 = vsyncpa [#allocation3], 1 }
 0x249   :  { %384 = vsyncpa [#allocation4], 1 }

</bundles_post_ra>
